<compile_context>
chip_gen: v7x
topology: tpu7x:2x2x1
jax: 0.10.0
libtpu: 0.0.40
codegen_flags: <defaults>
</compile_context>

<pallas_src>
import functools

import jax
import jax.numpy as jnp
from jax.experimental import pallas as pl
from jax.experimental.pallas import tpu as pltpu


_VMEM_BUDGET_BYTES = 44 << 20  # conservative: fits v5e/v6e (128 MiB) and v7x (64 MiB)


def _round_up(x, m):
    return ((x + m - 1) // m) * m


def _pad2(a, shape):
    pads = [(0, s - d) for d, s in zip(a.shape, shape)]
    if any(p[1] for p in pads):
        a = jnp.pad(a, pads)
    return a


def _num_tensorcores():
    """Best-effort core count: v7x has 2 TensorCores/chip; v5e/v6e have 1."""
    try:
        kind = jax.devices()[0].device_kind.lower()
        if "v7" in kind:
            return 2
    except Exception:
        pass
    return 1


def _ffd_kernel(x_ref, w1_ref, b1_ref, w2_ref, b2_ref, o_ref, h_ref,
                *, tn, w2_resident):
    # Grid: i = batch tile ("parallel"), j = output-feature tile ("arbitrary").
    # NOTE: the hidden-activation cache below relies on j being the innermost,
    # sequentially iterated ("arbitrary") axis. Do not reorder the grid axes or
    # mark j "parallel" -- results would silently be wrong.
    j = pl.program_id(1)

    # Layer 1 (x @ W1 + b1, ReLU): computed once per batch tile, cached in a
    # compute_dtype VMEM scratch, reused for every output-feature tile.
    @pl.when(j == 0)
    def _():
        h = jnp.dot(x_ref[...], w1_ref[...], preferred_element_type=jnp.float32)
        h = jnp.maximum(h + b1_ref[...].astype(jnp.float32), 0.0)
        h_ref[...] = h.astype(h_ref.dtype)

    # Layer 2 (h @ W2 + b2) for this (batch tile, output tile).
    if w2_resident:
        off = pl.multiple_of(j * tn, 128)
        w2 = w2_ref[:, pl.ds(off, tn)]
        b2 = b2_ref[:, pl.ds(off, tn)]
    else:
        w2 = w2_ref[...]
        b2 = b2_ref[...]
    y = jnp.dot(h_ref[...], w2, preferred_element_type=jnp.float32)
    o_ref[...] = (y + b2.astype(jnp.float32)).astype(o_ref.dtype)


def make_feedforward(w1, b1, w2, b2, *, compute_dtype=jnp.bfloat16,
                     out_dtype=None, tm=512, tn=512,
                     vmem_budget_bytes=_VMEM_BUDGET_BYTES,
                     single_buffer_resident=True):
    """Pads/casts the weights once and returns `apply(x) -> y`.

    Equivalent to PyTorch nn.Sequential(Linear(n_in, n_out), ReLU(),
    Linear(n_out, n_out)).  w1: (n_in, n_out), b1: (n_out,), w2: (n_out, n_out),
    b2: (n_out,).  compute_dtype (default bf16) is used for MXU operands; the
    accumulation, bias add and ReLU stay in f32.
    """
    w1 = jnp.asarray(w1)
    w2 = jnp.asarray(w2)
    n_in, n_hidden = w1.shape
    if w2.shape[0] != n_hidden:
        raise ValueError("w2 must have shape (n_out, n_out) matching w1's n_out")
    n_out = w2.shape[1]

    # Pad feature dims to lane multiples (128).
    p_in = _round_up(n_in, 128)
    p_h = _round_up(n_hidden, 128)
    p_out_base = _round_up(n_out, 128)

    # Output tile width: lane-dense multiple of 128.  Pad p_out up to a multiple
    # of tn instead of collapsing to 128; shrink tn only if the padding would
    # waste more than ~25% of the output columns.
    tn = max(128, min(_round_up(tn, 128), p_out_base))
    while tn > 128 and (_round_up(p_out_base, tn) - p_out_base) * 4 > p_out_base:
        tn -= 128
    p_out = _round_up(p_out_base, tn)

    cdt = jnp.dtype(compute_dtype)
    cdt_size = cdt.itemsize

    # One-time weight padding / casting (kept out of the per-call hot path).
    w1p = _pad2(w1, (p_in, p_h)).astype(cdt)
    b1p = _pad2(jnp.asarray(b1).reshape(1, n_hidden), (1, p_h)).astype(jnp.float32)
    w2p = _pad2(w2, (p_h, p_out)).astype(cdt)
    b2p = _pad2(jnp.asarray(b2).reshape(1, n_out), (1, p_out)).astype(jnp.float32)

    ncores = _num_tensorcores()

    def apply(x):
        B, d_in = x.shape
        if d_in != n_in:
            raise ValueError(f"expected x with {n_in} features, got {d_in}")
        odt = x.dtype if out_dtype is None else out_dtype
        osz = jnp.dtype(odt).itemsize

        # ---- batch tile selection --------------------------------------
        b_pad8 = _round_up(B, 8)
        tm_ = _round_up(min(tm, b_pad8), 8)
        # v7x: the batch axis is the only "parallel" axis -- make sure there are
        # at least 2 batch tiles so both TensorCores get work.
        while pl.cdiv(b_pad8, tm_) < ncores and tm_ > 8:
            tm_ = max(8, _round_up(tm_ // 2, 8))
        tn_ = tn

        # ---- VMEM footprint model (conservative: double-buffered) -------
        def footprint(tm2, tn2, resident):
            w1b = 2 * p_in * p_h * cdt_size + 2 * p_h * 4       # W1 + b1
            xb = 2 * tm2 * p_in * cdt_size                       # x tile
            hb = tm2 * p_h * cdt_size                            # hidden scratch
            ob = 2 * tm2 * tn2 * osz                             # output tile
            if resident:
                w2b = 2 * p_h * p_out * cdt_size + 2 * p_out * 4
            else:
                w2b = 2 * p_h * tn2 * cdt_size + 2 * tn2 * 4
            return w1b + xb + hb + ob + w2b

        # Prefer a fully resident W2 (removes per-batch-tile W2 re-streaming and
        # makes the inner loop MXU-bound); shrink tm (>=128) if needed to fit.
        tm_floor = max(8, min(128, tm_))
        tm_res = tm_
        while footprint(tm_res, tn_, True) > vmem_budget_bytes and tm_res > tm_floor:
            tm_res = max(tm_floor, _round_up(tm_res // 2, 8))
        if footprint(tm_res, tn_, True) <= vmem_budget_bytes:
            w2_resident = True
            tm_ = tm_res
        else:
            # Streamed W2 panels: keep tm large (arithmetic intensity ~ tm
            # flop/byte on W2), shrink tn among 128-multiples dividing p_out,
            # then tm, until the footprint fits.
            w2_resident = False
            for d in [d for d in range(tn_, 0, -128) if p_out % d == 0]:
                tn_ = d
                if footprint(tm_, tn_, False) <= vmem_budget_bytes:
                    break
            while footprint(tm_, tn_, False) > vmem_budget_bytes and tm_ > 8:
                tm_ = max(8, _round_up(tm_ // 2, 8))
            # TODO(synk): if it still does not fit here, K-tiling over
            # p_in / p_h is required (resident W1 + hidden scratch too big).

        p_b = _round_up(B, tm_)
        nbt = p_b // tm_
        grid = (nbt, p_out // tn_)

        fp = footprint(tm_, tn_, w2_resident)
        vmem_cap = max(58 << 20, vmem_budget_bytes + (8 << 20))
        vmem_limit = int(min(max(fp + fp // 4 + (2 << 20), 16 << 20), vmem_cap))

        w2_reads = 1 if w2_resident else nbt
        cost = pl.CostEstimate(
            flops=2 * p_b * (p_in * p_h + p_h * p_out),
            transcendentals=0,
            bytes_accessed=int(
                p_b * p_in * cdt_size          # x
                + p_in * p_h * cdt_size        # W1 (resident, read once)
                + p_h * 4                      # b1
                + w2_reads * p_h * p_out * cdt_size
                + w2_reads * p_out * 4
                + p_b * p_out * osz),          # out
        )

        xp = _pad2(x, (p_b, p_in)).astype(cdt)
        kernel = functools.partial(_ffd_kernel, tn=tn_, w2_resident=w2_resident)

        def run(single_buffer):
            res_kw = {}
            if single_buffer:
                # Grid-invariant operands don't need a second pipeline buffer.
                res_kw = dict(pipeline_mode=pl.Buffered(1))
            if w2_resident:
                w2_spec = pl.BlockSpec((p_h, p_out), lambda i, j: (0, 0), **res_kw)
                b2_spec = pl.BlockSpec((1, p_out), lambda i, j: (0, 0), **res_kw)
            else:
                w2_spec = pl.BlockSpec((p_h, tn_), lambda i, j: (0, j))
                b2_spec = pl.BlockSpec((1, tn_), lambda i, j: (0, j))
            grid_spec = pltpu.PrefetchScalarGridSpec(
                num_scalar_prefetch=0,
                grid=grid,
                in_specs=[
                    pl.BlockSpec((tm_, p_in), lambda i, j: (i, 0)),            # x
                    pl.BlockSpec((p_in, p_h), lambda i, j: (0, 0), **res_kw),  # W1
                    pl.BlockSpec((1, p_h), lambda i, j: (0, 0), **res_kw),     # b1
                    w2_spec,                                                   # W2
                    b2_spec,                                                   # b2
                ],
                out_specs=pl.BlockSpec((tm_, tn_), lambda i, j: (i, j)),
                scratch_shapes=[pltpu.VMEM((tm_, p_h), cdt)],  # cached hidden
            )
            return pl.pallas_call(
                kernel,
                out_shape=jax.ShapeDtypeStruct((p_b, p_out), odt),
                grid_spec=grid_spec,
                compiler_params=pltpu.CompilerParams(
                    dimension_semantics=("parallel", "arbitrary"),
                    vmem_limit_bytes=vmem_limit),
                cost_estimate=cost,
            )(xp, w1p, b1p, w2p, b2p)

        if single_buffer_resident:
            try:
                out = run(True)
            except Exception:
                # pl.Buffered(1) unsupported on this JAX/Mosaic version ->
                # fall back to default double-buffering.
                out = run(False)
        else:
            out = run(False)

        return out[:B, :n_out]

    return apply


def feedforward(x, w1, b1, w2, b2, **kwargs):
    """One-shot convenience wrapper (re-pads/casts the weights on every call;
    prefer make_feedforward() for repeated invocations)."""
    return make_feedforward(w1, b1, w2, b2, **kwargs)(x)


def init_params(key, n_in, n_out, dtype=jnp.float32):
    # Deterministic init mimicking PyTorch nn.Linear (uniform(-1/sqrt(fan_in), ...)).
    k1, k2, k3, k4 = jax.random.split(key, 4)
    lim1 = 1.0 / jnp.sqrt(jnp.float32(n_in))
    lim2 = 1.0 / jnp.sqrt(jnp.float32(n_out))
    w1 = jax.random.uniform(k1, (n_in, n_out), dtype, -lim1, lim1)
    b1 = jax.random.uniform(k2, (1, n_out), dtype, -lim1, lim1)
    w2 = jax.random.uniform(k3, (n_out, n_out), dtype, -lim2, lim2)
    b2 = jax.random.uniform(k4, (1, n_out), dtype, -lim2, lim2)
    return w1, b1, w2, b2


def _ref(x, w1, b1, w2, b2):
    h = jnp.maximum(x @ w1 + b1, 0.0)
    return h @ w2 + b2


if __name__ == "__main__":
    key = jax.random.PRNGKey(0)
    kx, kp, kx2, kp2 = jax.random.split(key, 4)

    # 1) Small single-tile shapes, default bf16 compute (f32 accumulation).
    B, n_in, n_out = 8, 16, 32
    x = jax.random.normal(kx, (B, n_in), jnp.float32)
    w1, b1, w2, b2 = init_params(kp, n_in, n_out)
    out = jax.block_until_ready(feedforward(x, w1, b1, w2, b2))
    assert out.shape == (B, n_out)
    assert jnp.allclose(out, _ref(x, w1, b1, w2, b2), atol=5e-2, rtol=5e-2)

    # 2) Multi-tile grid (2 batch tiles x 2 output tiles), resident W2 sliced
    #    per output tile, cached-hidden reuse across j; f32 compute for an
    #    exact-ish comparison against the reference.
    B2, n_in2, n_out2 = 16, 48, 160
    x2 = jax.random.normal(kx2, (B2, n_in2), jnp.float32)
    w1b, b1b, w2b, b2b = init_params(kp2, n_in2, n_out2)
    ffd2 = make_feedforward(w1b, b1b, w2b, b2b, compute_dtype=jnp.float32,
                            tm=8, tn=128)
    out2 = jax.block_until_ready(ffd2(x2))
    assert out2.shape == (B2, n_out2)
    assert jnp.allclose(out2, _ref(x2, w1b, b1b, w2b, b2b), atol=1e-4, rtol=1e-4)

    # 3) Same shapes with a tiny VMEM budget to force the streamed-W2 path.
    ffd3 = make_feedforward(w1b, b1b, w2b, b2b, compute_dtype=jnp.float32,
                            tm=8, tn=128, vmem_budget_bytes=400 * 1024)
    out3 = jax.block_until_ready(ffd3(x2))
    assert jnp.allclose(out3, _ref(x2, w1b, b1b, w2b, b2b), atol=1e-4, rtol=1e-4)

    print("KERNEL_OK")
</pallas_src>

<mosaic_0001>
module attributes {stable_mosaic.version = 11 : i64} {
  func.func @_ffd_kernel(%arg0: i32, %arg1: i32, %arg2: memref<8x128xbf16, #tpu.memory_space<vmem>>, %arg3: memref<128x128xbf16, #tpu.memory_space<vmem>>, %arg4: memref<1x128xf32, #tpu.memory_space<vmem>>, %arg5: memref<128x128xbf16, #tpu.memory_space<vmem>>, %arg6: memref<1x128xf32, #tpu.memory_space<vmem>>, %arg7: memref<8x128xf32, #tpu.memory_space<vmem>>, %arg8: memref<8x128xbf16, #tpu.memory_space<vmem>>) attributes {dimension_semantics = [#tpu.dimension_semantics<parallel>, #tpu.dimension_semantics<arbitrary>], iteration_bounds = array<i64: 1, 1>, scalar_prefetch = 0 : i64, scratch_operands = 1 : i64, tpu.core_type = #tpu.core_type<tc>, window_params = [{transform_indices = @transform_0, window_bounds = array<i64: 8, 128>}, {pipeline_mode = #tpu.pipeline_mode<synchronous>, transform_indices = @transform_1, window_bounds = array<i64: 128, 128>}, {pipeline_mode = #tpu.pipeline_mode<synchronous>, transform_indices = @transform_2, window_bounds = array<i64: 1, 128>}, {pipeline_mode = #tpu.pipeline_mode<synchronous>, transform_indices = @transform_3, window_bounds = array<i64: 128, 128>}, {pipeline_mode = #tpu.pipeline_mode<synchronous>, transform_indices = @transform_4, window_bounds = array<i64: 1, 128>}, {transform_indices = @transform_5, window_bounds = array<i64: 8, 128>}]} {
    %c0_i32 = arith.constant 0 : i32
    %0 = arith.cmpi eq, %arg1, %c0_i32 : i32
    %1 = arith.extui %0 : i1 to i32
    %c0_i32_0 = arith.constant 0 : i32
    %2 = arith.cmpi ne, %1, %c0_i32_0 : i32
    scf.if %2 {
      %c0_6 = arith.constant 0 : index
      %c0_7 = arith.constant 0 : index
      %14 = vector.load %arg2[%c0_6, %c0_7] : memref<8x128xbf16, #tpu.memory_space<vmem>>, vector<8x128xbf16>
      %c0_8 = arith.constant 0 : index
      %c0_9 = arith.constant 0 : index
      %15 = vector.load %arg3[%c0_8, %c0_9] : memref<128x128xbf16, #tpu.memory_space<vmem>>, vector<128x128xbf16>
      %cst_10 = arith.constant dense<0.000000e+00> : vector<8x128xf32>
      %16 = tpu.matmul %14, %15, %cst_10 {dimension_numbers = #tpu.dot_dimension_numbers<[1], [0], [0], [1], [0, 0, 1, 1], [], []>} : vector<8x128xbf16>, vector<128x128xbf16>, vector<8x128xf32> -> vector<8x128xf32>
      %c0_11 = arith.constant 0 : index
      %c0_12 = arith.constant 0 : index
      %17 = vector.load %arg4[%c0_11, %c0_12] : memref<1x128xf32, #tpu.memory_space<vmem>>, vector<1x128xf32>
      %18 = vector.broadcast %17 : vector<1x128xf32> to vector<8x128xf32>
      %19 = arith.addf %16, %18 : vector<8x128xf32>
      %cst_13 = arith.constant 0.000000e+00 : f32
      %20 = vector.broadcast %cst_13 : f32 to vector<8x128xf32>
      %21 = arith.maximumf %19, %20 : vector<8x128xf32>
      %22 = arith.truncf %21 : vector<8x128xf32> to vector<8x128xbf16>
      %c0_14 = arith.constant 0 : index
      %c0_15 = arith.constant 0 : index
      %23 = vector.load %arg8[%c0_14, %c0_15] : memref<8x128xbf16, #tpu.memory_space<vmem>>, vector<8x128xbf16>
      tpu.vector_store %arg8[%c0_14, %c0_15], %22 {strides = array<i32>} : memref<8x128xbf16, #tpu.memory_space<vmem>>, vector<8x128xbf16>,
    } else {
    }
    %c128_i32 = arith.constant 128 : i32
    %3 = arith.muli %arg1, %c128_i32 : i32
    %4 = tpu.assume_multiple %3, 128 : i32
    %c0 = arith.constant 0 : index
    %5 = arith.index_cast %4 : i32 to index
    %6 = vector.load %arg5[%c0, %5] : memref<128x128xbf16, #tpu.memory_space<vmem>>, vector<128x128xbf16>
    %c0_1 = arith.constant 0 : index
    %7 = arith.index_cast %4 : i32 to index
    %8 = vector.load %arg6[%c0_1, %7] : memref<1x128xf32, #tpu.memory_space<vmem>>, vector<1x128xf32>
    %c0_2 = arith.constant 0 : index
    %c0_3 = arith.constant 0 : index
    %9 = vector.load %arg8[%c0_2, %c0_3] : memref<8x128xbf16, #tpu.memory_space<vmem>>, vector<8x128xbf16>
    %cst = arith.constant dense<0.000000e+00> : vector<8x128xf32>
    %10 = tpu.matmul %9, %6, %cst {dimension_numbers = #tpu.dot_dimension_numbers<[1], [0], [0], [1], [0, 0, 1, 1], [], []>} : vector<8x128xbf16>, vector<128x128xbf16>, vector<8x128xf32> -> vector<8x128xf32>
    %11 = vector.broadcast %8 : vector<1x128xf32> to vector<8x128xf32>
    %12 = arith.addf %10, %11 : vector<8x128xf32>
    %c0_4 = arith.constant 0 : index
    %c0_5 = arith.constant 0 : index
    %13 = vector.load %arg7[%c0_4, %c0_5] : memref<8x128xf32, #tpu.memory_space<vmem>>, vector<8x128xf32>
    tpu.vector_store %arg7[%c0_4, %c0_5], %12 {strides = array<i32>} : memref<8x128xf32, #tpu.memory_space<vmem>>, vector<8x128xf32>,
    return
  }
  func.func @transform_0(%arg0: i32, %arg1: i32) -> (i32, i32) {
    %c0_i32 = arith.constant 0 : i32
    %c0_i32_0 = arith.constant 0 : i32
    return %arg0, %c0_i32 : i32, i32
  }
  func.func @transform_1(%arg0: i32, %arg1: i32) -> (i32, i32) {
    %c0_i32 = arith.constant 0 : i32
    %c0_i32_0 = arith.constant 0 : i32
    %c0_i32_1 = arith.constant 0 : i32
    return %c0_i32, %c0_i32_0 : i32, i32
  }
  func.func @transform_2(%arg0: i32, %arg1: i32) -> (i32, i32) {
    %c0_i32 = arith.constant 0 : i32
    %c0_i32_0 = arith.constant 0 : i32
    %c0_i32_1 = arith.constant 0 : i32
    return %c0_i32, %c0_i32_0 : i32, i32
  }
  func.func @transform_3(%arg0: i32, %arg1: i32) -> (i32, i32) {
    %c0_i32 = arith.constant 0 : i32
    %c0_i32_0 = arith.constant 0 : i32
    %c0_i32_1 = arith.constant 0 : i32
    return %c0_i32, %c0_i32_0 : i32, i32
  }
  func.func @transform_4(%arg0: i32, %arg1: i32) -> (i32, i32) {
    %c0_i32 = arith.constant 0 : i32
    %c0_i32_0 = arith.constant 0 : i32
    %c0_i32_1 = arith.constant 0 : i32
    return %c0_i32, %c0_i32_0 : i32, i32
  }
  func.func @transform_5(%arg0: i32, %arg1: i32) -> (i32, i32) {
    %c0_i32 = arith.constant 0 : i32
    return %arg0, %arg1 : i32, i32
  }
}

module attributes {stable_mosaic.version = 11 : i64} {
  func.func @_ffd_kernel(%arg0: i32, %arg1: i32, %arg2: memref<8x128xbf16, #tpu.memory_space<vmem>>, %arg3: memref<128x128xbf16, #tpu.memory_space<vmem>>, %arg4: memref<1x128xf32, #tpu.memory_space<vmem>>, %arg5: memref<128x128xbf16, #tpu.memory_space<vmem>>, %arg6: memref<1x128xf32, #tpu.memory_space<vmem>>, %arg7: memref<8x128xf32, #tpu.memory_space<vmem>>, %arg8: memref<8x128xbf16, #tpu.memory_space<vmem>>) attributes {dimension_semantics = [#tpu.dimension_semantics<parallel>, #tpu.dimension_semantics<arbitrary>], iteration_bounds = array<i64: 1, 1>, scalar_prefetch = 0 : i64, scratch_operands = 1 : i64, tpu.core_type = #tpu.core_type<tc>, window_params = [{transform_indices = @transform_0, window_bounds = array<i64: 8, 128>}, {pipeline_mode = #tpu.pipeline_mode<synchronous>, transform_indices = @transform_1, window_bounds = array<i64: 128, 128>}, {pipeline_mode = #tpu.pipeline_mode<synchronous>, transform_indices = @transform_2, window_bounds = array<i64: 1, 128>}, {pipeline_mode = #tpu.pipeline_mode<synchronous>, transform_indices = @transform_3, window_bounds = array<i64: 128, 128>}, {pipeline_mode = #tpu.pipeline_mode<synchronous>, transform_indices = @transform_4, window_bounds = array<i64: 1, 128>}, {transform_indices = @transform_5, window_bounds = array<i64: 8, 128>}]} {
    %c0_i32 = arith.constant 0 : i32
    %0 = arith.cmpi eq, %arg1, %c0_i32 : i32
    %1 = arith.extui %0 : i1 to i32
    %c0_i32_0 = arith.constant 0 : i32
    %2 = arith.cmpi ne, %1, %c0_i32_0 : i32
    scf.if %2 {
      %c0_6 = arith.constant 0 : index
      %c0_7 = arith.constant 0 : index
      %14 = vector.load %arg2[%c0_6, %c0_7] : memref<8x128xbf16, #tpu.memory_space<vmem>>, vector<8x128xbf16>
      %c0_8 = arith.constant 0 : index
      %c0_9 = arith.constant 0 : index
      %15 = vector.load %arg3[%c0_8, %c0_9] : memref<128x128xbf16, #tpu.memory_space<vmem>>, vector<128x128xbf16>
      %cst_10 = arith.constant dense<0.000000e+00> : vector<8x128xf32>
      %16 = tpu.matmul %14, %15, %cst_10 {dimension_numbers = #tpu.dot_dimension_numbers<[1], [0], [0], [1], [0, 0, 1, 1], [], []>} : vector<8x128xbf16>, vector<128x128xbf16>, vector<8x128xf32> -> vector<8x128xf32>
      %c0_11 = arith.constant 0 : index
      %c0_12 = arith.constant 0 : index
      %17 = vector.load %arg4[%c0_11, %c0_12] : memref<1x128xf32, #tpu.memory_space<vmem>>, vector<1x128xf32>
      %18 = vector.broadcast %17 : vector<1x128xf32> to vector<8x128xf32>
      %19 = arith.addf %16, %18 : vector<8x128xf32>
      %cst_13 = arith.constant 0.000000e+00 : f32
      %20 = vector.broadcast %cst_13 : f32 to vector<8x128xf32>
      %21 = arith.maximumf %19, %20 : vector<8x128xf32>
      %22 = arith.truncf %21 : vector<8x128xf32> to vector<8x128xbf16>
      %c0_14 = arith.constant 0 : index
      %c0_15 = arith.constant 0 : index
      %23 = vector.load %arg8[%c0_14, %c0_15] : memref<8x128xbf16, #tpu.memory_space<vmem>>, vector<8x128xbf16>
      tpu.vector_store %arg8[%c0_14, %c0_15], %22 {strides = array<i32>} : memref<8x128xbf16, #tpu.memory_space<vmem>>, vector<8x128xbf16>,
    } else {
    }
    %c128_i32 = arith.constant 128 : i32
    %3 = arith.muli %arg1, %c128_i32 : i32
    %4 = tpu.assume_multiple %3, 128 : i32
    %c0 = arith.constant 0 : index
    %5 = arith.index_cast %4 : i32 to index
    %6 = vector.load %arg5[%c0, %5] : memref<128x128xbf16, #tpu.memory_space<vmem>>, vector<128x128xbf16>
    %c0_1 = arith.constant 0 : index
    %7 = arith.index_cast %4 : i32 to index
    %8 = vector.load %arg6[%c0_1, %7] : memref<1x128xf32, #tpu.memory_space<vmem>>, vector<1x128xf32>
    %c0_2 = arith.constant 0 : index
    %c0_3 = arith.constant 0 : index
    %9 = vector.load %arg8[%c0_2, %c0_3] : memref<8x128xbf16, #tpu.memory_space<vmem>>, vector<8x128xbf16>
    %cst = arith.constant dense<0.000000e+00> : vector<8x128xf32>
    %10 = tpu.matmul %9, %6, %cst {dimension_numbers = #tpu.dot_dimension_numbers<[1], [0], [0], [1], [0, 0, 1, 1], [], []>} : vector<8x128xbf16>, vector<128x128xbf16>, vector<8x128xf32> -> vector<8x128xf32>
    %11 = vector.broadcast %8 : vector<1x128xf32> to vector<8x128xf32>
    %12 = arith.addf %10, %11 : vector<8x128xf32>
    %c0_4 = arith.constant 0 : index
    %c0_5 = arith.constant 0 : index
    %13 = vector.load %arg7[%c0_4, %c0_5] : memref<8x128xf32, #tpu.memory_space<vmem>>, vector<8x128xf32>
    tpu.vector_store %arg7[%c0_4, %c0_5], %12 {strides = array<i32>} : memref<8x128xf32, #tpu.memory_space<vmem>>, vector<8x128xf32>,
    return
  }
  func.func @transform_0(%arg0: i32, %arg1: i32) -> (i32, i32) {
    %c0_i32 = arith.constant 0 : i32
    %c0_i32_0 = arith.constant 0 : i32
    return %arg0, %c0_i32 : i32, i32
  }
  func.func @transform_1(%arg0: i32, %arg1: i32) -> (i32, i32) {
    %c0_i32 = arith.constant 0 : i32
    %c0_i32_0 = arith.constant 0 : i32
    %c0_i32_1 = arith.constant 0 : i32
    return %c0_i32, %c0_i32_0 : i32, i32
  }
  func.func @transform_2(%arg0: i32, %arg1: i32) -> (i32, i32) {
    %c0_i32 = arith.constant 0 : i32
    %c0_i32_0 = arith.constant 0 : i32
    %c0_i32_1 = arith.constant 0 : i32
    return %c0_i32, %c0_i32_0 : i32, i32
  }
  func.func @transform_3(%arg0: i32, %arg1: i32) -> (i32, i32) {
    %c0_i32 = arith.constant 0 : i32
    %c0_i32_0 = arith.constant 0 : i32
    %c0_i32_1 = arith.constant 0 : i32
    return %c0_i32, %c0_i32_0 : i32, i32
  }
  func.func @transform_4(%arg0: i32, %arg1: i32) -> (i32, i32) {
    %c0_i32 = arith.constant 0 : i32
    %c0_i32_0 = arith.constant 0 : i32
    %c0_i32_1 = arith.constant 0 : i32
    return %c0_i32, %c0_i32_0 : i32, i32
  }
  func.func @transform_5(%arg0: i32, %arg1: i32) -> (i32, i32) {
    %c0_i32 = arith.constant 0 : i32
    return %arg0, %arg1 : i32, i32
  }
}

</mosaic_0001>

<bundles_post_ra>
// kernel: tpu_custom_call.1
= control target key start
LH: loop header
LB: loop body
LE: loop exit
PB: predicated region body
PF: predicated region fallthrough
CT: control target
= control target key end

     0   :  { %10 = vsyncpa [#allocation4], 0  ;;  %s610_s0 = inlined_call_operand.hbm [shape: bf16[8,128], index: 0, kind: input, shape index: {}]   ;;  %s611_s1 = inlined_call_operand.hbm [shape: bf16[128,128], index: 1, kind: input, shape index: {}]   ;;  %s612_s2 = inlined_call_operand.vmem [shape: f32[1,128], index: 2, kind: input, shape index: {}]   ;;  %s613_s3 = inlined_call_operand.hbm [shape: bf16[128,128], index: 3, kind: input, shape index: {}]   ;;  %s614_s4 = inlined_call_operand.vmem [shape: f32[1,128], index: 4, kind: input, shape index: {}]   ;;  %s615_s5 = inlined_call_operand.hbm [shape: f32[8,128], index: 5, kind: output, shape index: {}]  }
   0x1   :  { %11 = vsyncpa [#allocation7], 0 }
   0x2   :  { %12 = vsyncpa [#allocation5], 0  ;;  %s512_s18 = smov [#allocation6]   ;;  %s418_s22 = scalar_lea.hbm %s611_s1, 1024 }
   0x3   :  { %s28_s19 = sshll.u32 %s512_s18, 4  ;;  %p419_p0 = scmp.ne.s32.totalorder %s611_s1, %s418_s22  ;;  %s29_s19 = int_to_ptr.vmem [resolvable:$true] %s28_s19 }
   0x4   :  { %p422_p1 = scmp.lt.u32.totalorder %s418_s22, %s611_s1 }
   0x6   :  { %p424_p2 = pnand %p422_p1, %p419_p0 }
   0x8   :  { %427 = shalt.err (!%p424_p2)
}
   0x9   :  { %s428_s27 = scalar_lea.vmem %s29_s19, 1024  ;;  %p433_p4 = scmp.lt.s32.totalorder %s29_s19, %s29_s19 }
   0xa   :  { %p429_p3 = scmp.ne.s32.totalorder %s29_s19, %s428_s27  ;;  %p434_p5 = scmp.lt.s32.totalorder %s428_s27, %s428_s27 }
   0xc   :  { %p435_p6 = por %p434_p5, %p433_p4 }
   0xe   :  { %p436_p7 = pnand %p435_p6, %p429_p3 }
  0x10   :  { %439 = shalt.err (!%p436_p7)
}
  0x11   :  { %s513_s28 = smov 64   ;;  %s514_s29 = smov 4  }
  0x12   :  { %34 = dma.hbm_to_vmem [thread:$0]  %s611_s1, 1024, %s29_s19, [#allocation7], %s513_s28, %s513_s28, %s514_s29  }
  0x13   :  { %s515_s7 = smov [#allocation3]   ;;  %s516_s9 = smov [#allocation8]  }
  0x14   :  { %s19_s8 = sshll.u32 %s515_s7, 4  ;;  %s42_s10 = sshll.u32 %s516_s9, 4  ;;  %s20_s8 = int_to_ptr.vmem [resolvable:$true] %s19_s8  ;;  %s43_s10 = int_to_ptr.vmem [resolvable:$true] %s42_s10 }
  0x15   :  { %s440_s13 = scalar_lea.hbm %s610_s0, 64 }
  0x16   :  { %p441_p8 = scmp.ne.s32.totalorder %s610_s0, %s440_s13  ;;  %p444_p9 = scmp.lt.u32.totalorder %s440_s13, %s610_s0 }
  0x18   :  { %p446_p10 = pnand %p444_p9, %p441_p8 }
  0x1a   :  { %449 = shalt.err (!%p446_p10)
}
  0x1b   :  { %s450_s1 = scalar_lea.vmem %s20_s8, 64  ;;  %p455_p12 = scmp.lt.s32.totalorder %s20_s8, %s20_s8 }
  0x1c   :  { %p451_p11 = scmp.ne.s32.totalorder %s20_s8, %s450_s1  ;;  %p456_p13 = scmp.lt.s32.totalorder %s450_s1, %s450_s1 }
  0x1e   :  { %p457_p0 = por %p456_p13, %p455_p12 }
  0x20   :  { %p458_p1 = pnand %p457_p0, %p451_p11 }
  0x22   :  { %461 = shalt.err (!%p458_p1)
}
  0x23   :  { %22 = dma.hbm_to_vmem [thread:$0]  %s610_s0, 64, %s20_s8, [#allocation4]  }
  0x24   :  { %s462_s22 = scalar_lea.hbm %s613_s3, 1024 }
  0x25   :  { %p463_p2 = scmp.ne.s32.totalorder %s613_s3, %s462_s22  ;;  %p466_p3 = scmp.lt.u32.totalorder %s462_s22, %s613_s3 }
  0x27   :  { %p468_p4 = pnand %p466_p3, %p463_p2 }
  0x29   :  { %471 = shalt.err (!%p468_p4)
}
  0x2a   :  { %s472_s27 = scalar_lea.vmem %s43_s10, 1024  ;;  %p477_p6 = scmp.lt.s32.totalorder %s43_s10, %s43_s10 }
  0x2b   :  { %p473_p5 = scmp.ne.s32.totalorder %s43_s10, %s472_s27  ;;  %p478_p7 = scmp.lt.s32.totalorder %s472_s27, %s472_s27 }
  0x2d   :  { %p479_p8 = por %p478_p7, %p477_p6 }
  0x2f   :  { %p480_p9 = pnand %p479_p8, %p473_p5 }
  0x31   :  { %483 = shalt.err (!%p480_p9)
}
  0x32   :  { %48 = dma.hbm_to_vmem [thread:$0]  %s613_s3, 1024, %s43_s10, [#allocation7], %s513_s28, %s513_s28, %s514_s29  }
  0x33   :  { %506 = dma.done.wait [#allocation4], 64  }
  0x34   :  { %507 = vsyncadd [#allocation4], 4294967232 }
  0x35   :  { %508 = dma.done.wait [#allocation7], 2048  }
  0x36   :  { %509 = vsyncadd [#allocation7], 4294965248  ;;  %v517_v0 = vmov 0.0   ;;  %vm518_vm0 = vmmov 0   ;;  %v402_v1 = vld [vmem:[#allocation6] sm:$0xff]   ;;  %v403_v2 = vld [vmem:[#allocation6 + $0x8] sm:$0xff]  }
  0x37   :  { %354 = vmatprep.subr.bf16.mxu0 %v517_v0  ;;  %370 = vmatprep.mubr.msk.bf16.mxu0 %vm518_vm0, %v517_v0  ;;  %v404_v3 = vld [vmem:[#allocation6 + $0x10] sm:$0xff]   ;;  %v410_v4 = vld [vmem:[#allocation8] sm:$0xff]   ;;  %v405_v5 = vld [vmem:[#allocation6 + $0x18] sm:$0xff]   ;;  %s519_s7 = smov [#allocation9]  }
  0x38   :  { %374 = vmatprep.subr.bf16.mxu1 %v517_v0  ;;  %390 = vmatprep.mubr.msk.bf16.mxu1 %vm518_vm0, %v517_v0  ;;  %v411_v6 = vld [vmem:[#allocation8 + $0x8] sm:$0xff]   ;;  %v406_v7 = vld [vmem:[#allocation6 + $0x20] sm:$0xff]   ;;  %v412_v8 = vld [vmem:[#allocation8 + $0x10] sm:$0xff]   ;;  %s305_s8 = sshll.u32 %s519_s7, 4  ;;  %s306_s8 = int_to_ptr.vmem [resolvable:$true] %s305_s8 }
  0x39   :  { %355 = vmatpush3.bf16.msra.mxu0 %v402_v1  ;;  %375 = vmatpush3.bf16.msra.mxu1 %v410_v4  ;;  %v407_v9 = vld [vmem:[#allocation6 + $0x28] sm:$0xff]   ;;  %v413_v10 = vld [vmem:[#allocation8 + $0x18] sm:$0xff]   ;;  %v408_v11 = vld [vmem:[#allocation6 + $0x30] sm:$0xff]   ;;  %p489_p11 = scmp.lt.s32.totalorder %s306_s8, %s306_s8 }
  0x3a   :  { %356 = vmatprep.subr.bf16.mxu0 %v517_v0  ;;  %376 = vmatprep.subr.bf16.mxu1 %v517_v0  ;;  %v409_v12 = vld [vmem:[#allocation6 + $0x38] sm:$0xff]   ;;  %v414_v14 = vld [vmem:[#allocation8 + $0x20] sm:$0xff]   ;;  %v415_v15 = vld [vmem:[#allocation8 + $0x28] sm:$0xff]  }
  0x3b   :  { %v65_v13 = vld [vmem:[#allocation3] sm:$0xf]  ;;  %v416_v16 = vld [vmem:[#allocation8 + $0x30] sm:$0xff]   ;;  %v318_v18 = vld [vmem:[%s612_s2] ss:$0 sm:$0xff]  ;;  %s484_s2 = scalar_lea.vmem %s306_s8, 128 }
  0x3c   :  { %v417_v17 = vld [vmem:[#allocation8 + $0x38] sm:$0xff]   ;;  %p485_p10 = scmp.ne.s32.totalorder %s306_s8, %s484_s2  ;;  %p490_p12 = scmp.lt.s32.totalorder %s484_s2, %s484_s2 }
  0x3d   :  { %357 = vmatpush3.bf16.msra.mxu0 %v403_v2  ;;  %377 = vmatpush3.bf16.msra.mxu1 %v411_v6  ;;  %v327_v27 = vld [vmem:[%s614_s4] ss:$0 sm:$0xff] }
  0x3e   :  { %358 = vmatprep.subr.bf16.mxu0 %v517_v0  ;;  %378 = vmatprep.subr.bf16.mxu1 %v517_v0  ;;  %p491_p13 = por %p490_p12, %p489_p11 }
  0x40   :  { %p492_p0 = pnand %p491_p13, %p485_p10 }
  0x41   :  { %359 = vmatpush3.bf16.msra.mxu0 %v404_v3  ;;  %379 = vmatpush3.bf16.msra.mxu1 %v412_v8 }
  0x42   :  { %360 = vmatprep.subr.bf16.mxu0 %v517_v0  ;;  %380 = vmatprep.subr.bf16.mxu1 %v517_v0 }
  0x45   :  { %361 = vmatpush3.bf16.msra.mxu0 %v405_v5  ;;  %381 = vmatpush3.bf16.msra.mxu1 %v413_v10 }
  0x46   :  { %362 = vmatprep.subr.bf16.mxu0 %v517_v0  ;;  %382 = vmatprep.subr.bf16.mxu1 %v517_v0 }
  0x49   :  { %363 = vmatpush3.bf16.msra.mxu0 %v406_v7  ;;  %383 = vmatpush3.bf16.msra.mxu1 %v414_v14 }
  0x4a   :  { %364 = vmatprep.subr.bf16.mxu0 %v517_v0  ;;  %384 = vmatprep.subr.bf16.mxu1 %v517_v0 }
  0x4d   :  { %365 = vmatpush3.bf16.msra.mxu0 %v407_v9  ;;  %385 = vmatpush3.bf16.msra.mxu1 %v415_v15 }
  0x4e   :  { %366 = vmatprep.subr.bf16.mxu0 %v517_v0  ;;  %386 = vmatprep.subr.bf16.mxu1 %v517_v0 }
  0x51   :  { %367 = vmatpush3.bf16.msra.mxu0 %v408_v11  ;;  %387 = vmatpush3.bf16.msra.mxu1 %v416_v16 }
  0x52   :  { %368 = vmatprep.subr.bf16.mxu0 %v517_v0  ;;  %388 = vmatprep.subr.bf16.mxu1 %v517_v0 }
  0x55   :  { %369 = vmatpush3.bf16.msra.mxu0 %v409_v12  ;;  %389 = vmatpush3.bf16.msra.mxu1 %v417_v17 }
  0x58   :  { %371 = vmatmul.mubr.bf16.vlgmr.msra.gmra.mrb[0].mxu0 %v65_v13 }
 0x12b   :  { %v171_v19 = vpop.f32.mrb[0].mxu0 }
 0x12c   :  { %v172_v20 = vadd.f32 %v318_v18, %v171_v19  ;;  %v372_v21 = vpop.f32.mrb[1].mxu0 }
 0x12d   :  { %v174_v22 = vpop.f32.mrb[2].mxu0 }
 0x12e   :  { %v177_v23 = vmax.f32 %v172_v20, 0.0  ;;  %v373_v24 = vpop.f32.mrb[3].mxu0 }
 0x130   :  { %v178_v25 = vpack.c.bf16 %v177_v23, %v177_v23 }
 0x132   :  { %179 = vst [vmem:[#allocation2] sm:$0xf] %v178_v25 }
 0x139   :  { %v203_v26 = vld [vmem:[#allocation2] sm:$0xf] }
 0x13a   :  { %391 = vmatmul.mubr.bf16.vlgmr.msra.gmra.mrb[0].mxu1 %v203_v26 }
 0x20d   :  { %v292_v28 = vpop.f32.mrb[0].mxu1 }
 0x20e   :  { %v293_v29 = vadd.f32 %v327_v27, %v292_v28  ;;  %v392_v30 = vpop.f32.mrb[1].mxu1 }
 0x20f   :  { %v295_v31 = vpop.f32.mrb[2].mxu1 }
 0x210   :  { %298 = vst [vmem:[#allocation9] sm:$0xff] %v293_v29  ;;  %v393_v32 = vpop.f32.mrb[3].mxu1 }
 0x211   :  { %495 = shalt.err (!%p492_p0)
}
 0x212   :  { %s496_s4 = scalar_lea.hbm %s615_s5, 128 }
 0x213   :  { %p497_p1 = scmp.ne.s32.totalorder %s615_s5, %s496_s4  ;;  %p500_p2 = scmp.lt.u32.totalorder %s496_s4, %s615_s5 }
 0x215   :  { %p502_p3 = pnand %p500_p2, %p497_p1 }
 0x217   :  { %505 = shalt.err (!%p502_p3)
}
 0x218   :  { %308 = dma.vmem_to_hbm [thread:$0]  %s306_s8, 128, %s615_s5, [#allocation5]  }
 0x219   :  { %510 = dma.done.wait [#allocation5], 128  }
 0x21a   :  { %511 = vsyncadd [#allocation5], 4294967168 }
 0x21b   :  { %312 = vsyncpa [#allocation4], 1 }
 0x21c   :  { %313 = vsyncpa [#allocation7], 1 }
 0x21d   :  { %314 = vsyncpa [#allocation5], 1 }

// kernel: tpu_custom_call.1
= control target key start
LH: loop header
LB: loop body
LE: loop exit
PB: predicated region body
PF: predicated region fallthrough
CT: control target
= control target key end

     0   :  { %10 = vsyncpa [#allocation4], 0  ;;  %s610_s0 = inlined_call_operand.hbm [shape: bf16[8,128], index: 0, kind: input, shape index: {}]   ;;  %s611_s1 = inlined_call_operand.hbm [shape: bf16[128,128], index: 1, kind: input, shape index: {}]   ;;  %s612_s2 = inlined_call_operand.vmem [shape: f32[1,128], index: 2, kind: input, shape index: {}]   ;;  %s613_s3 = inlined_call_operand.hbm [shape: bf16[128,128], index: 3, kind: input, shape index: {}]   ;;  %s614_s4 = inlined_call_operand.vmem [shape: f32[1,128], index: 4, kind: input, shape index: {}]   ;;  %s615_s5 = inlined_call_operand.hbm [shape: f32[8,128], index: 5, kind: output, shape index: {}]  }
   0x1   :  { %11 = vsyncpa [#allocation7], 0 }
   0x2   :  { %12 = vsyncpa [#allocation5], 0  ;;  %s512_s18 = smov [#allocation6]   ;;  %s418_s22 = scalar_lea.hbm %s611_s1, 1024 }
   0x3   :  { %s28_s19 = sshll.u32 %s512_s18, 4  ;;  %p419_p0 = scmp.ne.s32.totalorder %s611_s1, %s418_s22  ;;  %s29_s19 = int_to_ptr.vmem [resolvable:$true] %s28_s19 }
   0x4   :  { %p422_p1 = scmp.lt.u32.totalorder %s418_s22, %s611_s1 }
   0x6   :  { %p424_p2 = pnand %p422_p1, %p419_p0 }
   0x8   :  { %427 = shalt.err (!%p424_p2)
}
   0x9   :  { %s428_s27 = scalar_lea.vmem %s29_s19, 1024  ;;  %p433_p4 = scmp.lt.s32.totalorder %s29_s19, %s29_s19 }
   0xa   :  { %p429_p3 = scmp.ne.s32.totalorder %s29_s19, %s428_s27  ;;  %p434_p5 = scmp.lt.s32.totalorder %s428_s27, %s428_s27 }
   0xc   :  { %p435_p6 = por %p434_p5, %p433_p4 }
   0xe   :  { %p436_p7 = pnand %p435_p6, %p429_p3 }
  0x10   :  { %439 = shalt.err (!%p436_p7)
}
  0x11   :  { %s513_s28 = smov 64   ;;  %s514_s29 = smov 4  }
  0x12   :  { %34 = dma.hbm_to_vmem [thread:$0]  %s611_s1, 1024, %s29_s19, [#allocation7], %s513_s28, %s513_s28, %s514_s29  }
  0x13   :  { %s515_s7 = smov [#allocation3]   ;;  %s516_s9 = smov [#allocation8]  }
  0x14   :  { %s19_s8 = sshll.u32 %s515_s7, 4  ;;  %s42_s10 = sshll.u32 %s516_s9, 4  ;;  %s20_s8 = int_to_ptr.vmem [resolvable:$true] %s19_s8  ;;  %s43_s10 = int_to_ptr.vmem [resolvable:$true] %s42_s10 }
  0x15   :  { %s440_s13 = scalar_lea.hbm %s610_s0, 64 }
  0x16   :  { %p441_p8 = scmp.ne.s32.totalorder %s610_s0, %s440_s13  ;;  %p444_p9 = scmp.lt.u32.totalorder %s440_s13, %s610_s0 }
  0x18   :  { %p446_p10 = pnand %p444_p9, %p441_p8 }
  0x1a   :  { %449 = shalt.err (!%p446_p10)
}
  0x1b   :  { %s450_s1 = scalar_lea.vmem %s20_s8, 64  ;;  %p455_p12 = scmp.lt.s32.totalorder %s20_s8, %s20_s8 }
  0x1c   :  { %p451_p11 = scmp.ne.s32.totalorder %s20_s8, %s450_s1  ;;  %p456_p13 = scmp.lt.s32.totalorder %s450_s1, %s450_s1 }
  0x1e   :  { %p457_p0 = por %p456_p13, %p455_p12 }
  0x20   :  { %p458_p1 = pnand %p457_p0, %p451_p11 }
  0x22   :  { %461 = shalt.err (!%p458_p1)
}
  0x23   :  { %22 = dma.hbm_to_vmem [thread:$0]  %s610_s0, 64, %s20_s8, [#allocation4]  }
  0x24   :  { %s462_s22 = scalar_lea.hbm %s613_s3, 1024 }
  0x25   :  { %p463_p2 = scmp.ne.s32.totalorder %s613_s3, %s462_s22  ;;  %p466_p3 = scmp.lt.u32.totalorder %s462_s22, %s613_s3 }
  0x27   :  { %p468_p4 = pnand %p466_p3, %p463_p2 }
  0x29   :  { %471 = shalt.err (!%p468_p4)
}
  0x2a   :  { %s472_s27 = scalar_lea.vmem %s43_s10, 1024  ;;  %p477_p6 = scmp.lt.s32.totalorder %s43_s10, %s43_s10 }
  0x2b   :  { %p473_p5 = scmp.ne.s32.totalorder %s43_s10, %s472_s27  ;;  %p478_p7 = scmp.lt.s32.totalorder %s472_s27, %s472_s27 }
  0x2d   :  { %p479_p8 = por %p478_p7, %p477_p6 }
  0x2f   :  { %p480_p9 = pnand %p479_p8, %p473_p5 }
  0x31   :  { %483 = shalt.err (!%p480_p9)
}
  0x32   :  { %48 = dma.hbm_to_vmem [thread:$0]  %s613_s3, 1024, %s43_s10, [#allocation7], %s513_s28, %s513_s28, %s514_s29  }
  0x33   :  { %506 = dma.done.wait [#allocation4], 64  }
  0x34   :  { %507 = vsyncadd [#allocation4], 4294967232 }
  0x35   :  { %508 = dma.done.wait [#allocation7], 2048  }
  0x36   :  { %509 = vsyncadd [#allocation7], 4294965248  ;;  %v517_v0 = vmov 0.0   ;;  %vm518_vm0 = vmmov 0   ;;  %v402_v1 = vld [vmem:[#allocation6] sm:$0xff]   ;;  %v403_v2 = vld [vmem:[#allocation6 + $0x8] sm:$0xff]  }
  0x37   :  { %354 = vmatprep.subr.bf16.mxu0 %v517_v0  ;;  %370 = vmatprep.mubr.msk.bf16.mxu0 %vm518_vm0, %v517_v0  ;;  %v404_v3 = vld [vmem:[#allocation6 + $0x10] sm:$0xff]   ;;  %v410_v4 = vld [vmem:[#allocation8] sm:$0xff]   ;;  %v405_v5 = vld [vmem:[#allocation6 + $0x18] sm:$0xff]   ;;  %s519_s7 = smov [#allocation9]  }
  0x38   :  { %374 = vmatprep.subr.bf16.mxu1 %v517_v0  ;;  %390 = vmatprep.mubr.msk.bf16.mxu1 %vm518_vm0, %v517_v0  ;;  %v411_v6 = vld [vmem:[#allocation8 + $0x8] sm:$0xff]   ;;  %v406_v7 = vld [vmem:[#allocation6 + $0x20] sm:$0xff]   ;;  %v412_v8 = vld [vmem:[#allocation8 + $0x10] sm:$0xff]   ;;  %s305_s8 = sshll.u32 %s519_s7, 4  ;;  %s306_s8 = int_to_ptr.vmem [resolvable:$true] %s305_s8 }
  0x39   :  { %355 = vmatpush3.bf16.msra.mxu0 %v402_v1  ;;  %375 = vmatpush3.bf16.msra.mxu1 %v410_v4  ;;  %v407_v9 = vld [vmem:[#allocation6 + $0x28] sm:$0xff]   ;;  %v413_v10 = vld [vmem:[#allocation8 + $0x18] sm:$0xff]   ;;  %v408_v11 = vld [vmem:[#allocation6 + $0x30] sm:$0xff]   ;;  %p489_p11 = scmp.lt.s32.totalorder %s306_s8, %s306_s8 }
  0x3a   :  { %356 = vmatprep.subr.bf16.mxu0 %v517_v0  ;;  %376 = vmatprep.subr.bf16.mxu1 %v517_v0  ;;  %v409_v12 = vld [vmem:[#allocation6 + $0x38] sm:$0xff]   ;;  %v414_v14 = vld [vmem:[#allocation8 + $0x20] sm:$0xff]   ;;  %v415_v15 = vld [vmem:[#allocation8 + $0x28] sm:$0xff]  }
  0x3b   :  { %v65_v13 = vld [vmem:[#allocation3] sm:$0xf]  ;;  %v416_v16 = vld [vmem:[#allocation8 + $0x30] sm:$0xff]   ;;  %v318_v18 = vld [vmem:[%s612_s2] ss:$0 sm:$0xff]  ;;  %s484_s2 = scalar_lea.vmem %s306_s8, 128 }
  0x3c   :  { %v417_v17 = vld [vmem:[#allocation8 + $0x38] sm:$0xff]   ;;  %p485_p10 = scmp.ne.s32.totalorder %s306_s8, %s484_s2  ;;  %p490_p12 = scmp.lt.s32.totalorder %s484_s2, %s484_s2 }
  0x3d   :  { %357 = vmatpush3.bf16.msra.mxu0 %v403_v2  ;;  %377 = vmatpush3.bf16.msra.mxu1 %v411_v6  ;;  %v327_v27 = vld [vmem:[%s614_s4] ss:$0 sm:$0xff] }
  0x3e   :  { %358 = vmatprep.subr.bf16.mxu0 %v517_v0  ;;  %378 = vmatprep.subr.bf16.mxu1 %v517_v0  ;;  %p491_p13 = por %p490_p12, %p489_p11 }
  0x40   :  { %p492_p0 = pnand %p491_p13, %p485_p10 }
  0x41   :  { %359 = vmatpush3.bf16.msra.mxu0 %v404_v3  ;;  %379 = vmatpush3.bf16.msra.mxu1 %v412_v8 }
  0x42   :  { %360 = vmatprep.subr.bf16.mxu0 %v517_v0  ;;  %380 = vmatprep.subr.bf16.mxu1 %v517_v0 }
  0x45   :  { %361 = vmatpush3.bf16.msra.mxu0 %v405_v5  ;;  %381 = vmatpush3.bf16.msra.mxu1 %v413_v10 }
  0x46   :  { %362 = vmatprep.subr.bf16.mxu0 %v517_v0  ;;  %382 = vmatprep.subr.bf16.mxu1 %v517_v0 }
  0x49   :  { %363 = vmatpush3.bf16.msra.mxu0 %v406_v7  ;;  %383 = vmatpush3.bf16.msra.mxu1 %v414_v14 }
  0x4a   :  { %364 = vmatprep.subr.bf16.mxu0 %v517_v0  ;;  %384 = vmatprep.subr.bf16.mxu1 %v517_v0 }
  0x4d   :  { %365 = vmatpush3.bf16.msra.mxu0 %v407_v9  ;;  %385 = vmatpush3.bf16.msra.mxu1 %v415_v15 }
  0x4e   :  { %366 = vmatprep.subr.bf16.mxu0 %v517_v0  ;;  %386 = vmatprep.subr.bf16.mxu1 %v517_v0 }
  0x51   :  { %367 = vmatpush3.bf16.msra.mxu0 %v408_v11  ;;  %387 = vmatpush3.bf16.msra.mxu1 %v416_v16 }
  0x52   :  { %368 = vmatprep.subr.bf16.mxu0 %v517_v0  ;;  %388 = vmatprep.subr.bf16.mxu1 %v517_v0 }
  0x55   :  { %369 = vmatpush3.bf16.msra.mxu0 %v409_v12  ;;  %389 = vmatpush3.bf16.msra.mxu1 %v417_v17 }
  0x58   :  { %371 = vmatmul.mubr.bf16.vlgmr.msra.gmra.mrb[0].mxu0 %v65_v13 }
 0x12b   :  { %v171_v19 = vpop.f32.mrb[0].mxu0 }
 0x12c   :  { %v172_v20 = vadd.f32 %v318_v18, %v171_v19  ;;  %v372_v21 = vpop.f32.mrb[1].mxu0 }
 0x12d   :  { %v174_v22 = vpop.f32.mrb[2].mxu0 }
 0x12e   :  { %v177_v23 = vmax.f32 %v172_v20, 0.0  ;;  %v373_v24 = vpop.f32.mrb[3].mxu0 }
 0x130   :  { %v178_v25 = vpack.c.bf16 %v177_v23, %v177_v23 }
 0x132   :  { %179 = vst [vmem:[#allocation2] sm:$0xf] %v178_v25 }
 0x139   :  { %v203_v26 = vld [vmem:[#allocation2] sm:$0xf] }
 0x13a   :  { %391 = vmatmul.mubr.bf16.vlgmr.msra.gmra.mrb[0].mxu1 %v203_v26 }
 0x20d   :  { %v292_v28 = vpop.f32.mrb[0].mxu1 }
 0x20e   :  { %v293_v29 = vadd.f32 %v327_v27, %v292_v28  ;;  %v392_v30 = vpop.f32.mrb[1].mxu1 }
 0x20f   :  { %v295_v31 = vpop.f32.mrb[2].mxu1 }
 0x210   :  { %298 = vst [vmem:[#allocation9] sm:$0xff] %v293_v29  ;;  %v393_v32 = vpop.f32.mrb[3].mxu1 }
 0x211   :  { %495 = shalt.err (!%p492_p0)
}
 0x212   :  { %s496_s4 = scalar_lea.hbm %s615_s5, 128 }
 0x213   :  { %p497_p1 = scmp.ne.s32.totalorder %s615_s5, %s496_s4  ;;  %p500_p2 = scmp.lt.u32.totalorder %s496_s4, %s615_s5 }
 0x215   :  { %p502_p3 = pnand %p500_p2, %p497_p1 }
 0x217   :  { %505 = shalt.err (!%p502_p3)
}
 0x218   :  { %308 = dma.vmem_to_hbm [thread:$0]  %s306_s8, 128, %s615_s5, [#allocation5]  }
 0x219   :  { %510 = dma.done.wait [#allocation5], 128  }
 0x21a   :  { %511 = vsyncadd [#allocation5], 4294967168 }
 0x21b   :  { %312 = vsyncpa [#allocation4], 1 }
 0x21c   :  { %313 = vsyncpa [#allocation7], 1 }
 0x21d   :  { %314 = vsyncpa [#allocation5], 1 }

</bundles_post_ra>
